<compile_context>
chip_gen: v7x
topology: tpu7x:2x2x1
jax: 0.10.0
libtpu: 0.0.40
codegen_flags: <defaults>
</compile_context>

<pallas_src>
import functools
import math

import jax
import jax.numpy as jnp
from jax import lax
from jax.experimental import pallas as pl
from jax.experimental.pallas import tpu as pltpu


# Default tiles: multiples of the (8, 128) vreg tile, 2x the v6e/v7x MXU width.
_TM = 512
_TN = 512
_TK = 512
# Keep the full contraction dim resident (no K grid axis / no accumulator
# scratch) up to this many K elements (f32): working set stays < ~20 MiB.
_K_RESIDENT_MAX = 2048


def _round_up(x, m):
    return (x + m - 1) // m * m


def _divisor_tile(dim, max_tile, quantum):
    """Largest multiple of `quantum` that divides `dim` and is <= max_tile.

    `dim` must itself be a multiple of `quantum` (so `quantum` always works).
    """
    t = min(max_tile, dim)
    t = max((t // quantum) * quantum, quantum)
    while dim % t != 0:
        t -= quantum
    return t


# ---------------------------------------------------------------------------
# Kernels
# ---------------------------------------------------------------------------

def _linear_bias_kernel(x_ref, w_ref, b_ref, o_ref, *, tn, precision):
    # Full-K-resident path: one MXU dot + bias add per (i, j) output tile.
    # x_ref: (tm, Kp)   w_ref: (Kp, tn)   b_ref: (1, Np) resident   o_ref: (tm, tn)
    j = pl.program_id(1)
    acc = jnp.dot(x_ref[...], w_ref[...],
                  preferred_element_type=jnp.float32, precision=precision)
    col = pl.multiple_of(j * tn, 128)
    bias = b_ref[:, pl.ds(col, tn)].astype(jnp.float32)
    o_ref[...] = (acc + bias).astype(o_ref.dtype)


def _linear_bias_kernel_ktiled(x_ref, w_ref, b_ref, o_ref, acc_ref, *, tn, precision):
    # K-tiled path (large in_features): f32 VMEM accumulator across the
    # innermost ("arbitrary") K grid axis, bias added once in the finalize.
    j = pl.program_id(1)
    k = pl.program_id(2)

    @pl.when(k == 0)
    def _init():
        acc_ref[...] = jnp.zeros_like(acc_ref)

    acc_ref[...] += jnp.dot(x_ref[...], w_ref[...],
                            preferred_element_type=jnp.float32,
                            precision=precision)

    @pl.when(k == pl.num_programs(2) - 1)
    def _finalize():
        col = pl.multiple_of(j * tn, 128)
        bias = b_ref[:, pl.ds(col, tn)].astype(jnp.float32)
        o_ref[...] = (acc_ref[...] + bias).astype(o_ref.dtype)


# ---------------------------------------------------------------------------
# Parameter preparation (one-time, NOT on the per-call hot path)
# ---------------------------------------------------------------------------

def prepare_bayes_linear_params(weight_mu, bias_mu=None):
    """Pad K/N up to multiples of 128 and transpose weight_mu from the PyTorch
    (out_features, in_features) layout to a K-major (Kp, Np) layout.

    Call once per parameter set and reuse the result for every forward call:
    the per-call path then only (maybe) pads the activation.
    """
    out_features, in_features = weight_mu.shape
    Kp = _round_up(in_features, 128)
    Np = _round_up(out_features, 128)
    w = weight_mu
    if (Np, Kp) != (out_features, in_features):
        w = jnp.pad(w, ((0, Np - out_features), (0, Kp - in_features)))
    w_t = jnp.transpose(w)                       # (Kp, Np) -> plain MXU contraction
    if bias_mu is None:
        b = jnp.zeros((Np,), dtype=weight_mu.dtype)
    elif Np != out_features:
        b = jnp.pad(bias_mu, (0, Np - out_features))
    else:
        b = bias_mu
    return w_t, b.reshape(1, Np), out_features, in_features


# ---------------------------------------------------------------------------
# Forward
# ---------------------------------------------------------------------------

def bayes_linear_forward(x, w_t, bias_row, out_features, in_features, *,
                         tm=_TM, tn=_TN, tk=_TK,
                         k_resident_max=_K_RESIDENT_MAX,
                         precision=lax.Precision.HIGHEST):
    """Forward of BayesLinear: x @ weight_mu.T + bias_mu.

    x:        (..., in_features)
    w_t:      (Kp, Np) pre-padded, pre-transposed weight from prepare_*()
    bias_row: (1, Np)  pre-padded bias from prepare_*()
    """
    orig_shape = x.shape
    assert orig_shape[-1] == in_features, "input feature dim mismatch"
    Kp, Np = w_t.shape

    x2 = x.reshape(-1, in_features)
    M = x2.shape[0]

    # ---- tile selection ---------------------------------------------------
    tm = tm if M > tm else max(_round_up(M, 8), 8)
    Mp = _round_up(M, tm)
    tn = _divisor_tile(Np, tn, 128)
    # Guarantee >=2 blocks along a "parallel" axis when the shape allows so
    # both TensorCores are used on v7x even for small-batch calls.
    if Mp // tm == 1 and Np // tn == 1 and Np >= 256:
        tn = _divisor_tile(Np, Np // 2, 128)

    use_k_grid = Kp > k_resident_max
    tk = _divisor_tile(Kp, tk, 128) if use_k_grid else Kp

    # ---- pad only the activation (weight/bias were padded once) -----------
    xp = x2
    if (Mp != M) or (Kp != in_features):
        xp = jnp.pad(x2, ((0, Mp - M), (0, Kp - in_features)))

    grid_m, grid_n = Mp // tm, Np // tn
    itemsize = jnp.dtype(x2.dtype).itemsize

    if use_k_grid:
        grid_k = Kp // tk
        kernel = functools.partial(_linear_bias_kernel_ktiled, tn=tn,
                                   precision=precision)
        grid = (grid_m, grid_n, grid_k)
        in_specs = [
            pl.BlockSpec((tm, tk), lambda i, j, k: (i, k)),   # x
            pl.BlockSpec((tk, tn), lambda i, j, k: (k, j)),   # weight (Kp, Np)
            pl.BlockSpec((1, Np), lambda i, j, k: (0, 0)),    # bias, resident
        ]
        out_spec = pl.BlockSpec((tm, tn), lambda i, j, k: (i, j))
        scratch = [pltpu.VMEM((tm, tn), jnp.float32)]
        dims = ("parallel", "parallel", "arbitrary")
        # K innermost: x re-read per N block, weight re-read per M block.
        bytes_accessed = (Mp * Kp * grid_n + Kp * Np * grid_m
                          + Np + Mp * Np) * itemsize
    else:
        kernel = functools.partial(_linear_bias_kernel, tn=tn,
                                   precision=precision)
        grid = (grid_m, grid_n)
        in_specs = [
            pl.BlockSpec((tm, Kp), lambda i, j: (i, 0)),      # x (K resident)
            pl.BlockSpec((Kp, tn), lambda i, j: (0, j)),      # weight (Kp, Np)
            pl.BlockSpec((1, Np), lambda i, j: (0, 0)),       # bias, resident
        ]
        out_spec = pl.BlockSpec((tm, tn), lambda i, j: (i, j))
        scratch = []
        dims = ("parallel", "parallel")
        # j innermost: x block index constant across j -> fetched once per i;
        # weight re-read per M block.
        bytes_accessed = (Mp * Kp + Kp * Np * grid_m + Np + Mp * Np) * itemsize

    cost = pl.CostEstimate(flops=2 * Mp * Kp * Np, transcendentals=0,
                           bytes_accessed=bytes_accessed)

    # Working set: double-buffered streams + resident bias (+ f32 accumulator).
    vmem_needed = 2 * (tm * tk + tk * tn + tm * tn) * itemsize + Np * itemsize
    if use_k_grid:
        vmem_needed += tm * tn * 4
    # >= default 32 MiB scoped limit, capped safely below v7x's 64 MiB physical.
    vmem_limit = int(min(max(vmem_needed + (4 << 20), 32 << 20), 56 << 20))

    out = pl.pallas_call(
        kernel,
        out_shape=jax.ShapeDtypeStruct((Mp, Np), x2.dtype),
        grid_spec=pltpu.PrefetchScalarGridSpec(
            num_scalar_prefetch=0,
            grid=grid,
            in_specs=in_specs,
            out_specs=out_spec,
            scratch_shapes=scratch,
        ),
        compiler_params=pltpu.CompilerParams(
            dimension_semantics=dims,
            vmem_limit_bytes=vmem_limit,
        ),
        cost_estimate=cost,
    )(xp, w_t, bias_row)

    out = out[:M, :out_features]
    return out.reshape(*orig_shape[:-1], out_features)


# ---------------------------------------------------------------------------
# Init helpers + self-test
# ---------------------------------------------------------------------------

def xavier_uniform(key, shape):
    # matches torch.nn.init.xavier_uniform_ for a 2-D (fan_out, fan_in) tensor
    fan_out, fan_in = shape
    bound = math.sqrt(6.0 / (fan_in + fan_out))
    return jax.random.uniform(key, shape, jnp.float32, -bound, bound)


if __name__ == "__main__":
    # TODO(synk): the module's per-forward `torch.randn_like(sigma)` eps
    # assignments and the freeze/unfreeze buffers never affect the returned
    # value, so they are intentionally not reproduced in the kernel.
    prior_mu, prior_sigma = 0.0, 0.1
    in_features, out_features = 32, 64
    batch, seq = 2, 4

    key = jax.random.PRNGKey(0)
    k_x, k_wmu, k_wsig, k_bmu, k_x2, k_w2, k_b2 = jax.random.split(key, 7)

    # Deterministic parameter init mirroring the module's __init__.
    weight_sigma = xavier_uniform(k_wsig, (out_features, in_features)) * 0.01  # unused in fwd
    weight_mu = xavier_uniform(k_wmu, (out_features, in_features))
    bias_mu = jax.random.normal(k_bmu, (out_features,), jnp.float32) * 0.01

    x = jax.random.normal(k_x, (batch, seq, in_features), jnp.float32)

    # --- small-shape (single-block, full-K-resident) check -----------------
    w_t, b_row, fout, fin = prepare_bayes_linear_params(weight_mu, bias_mu)
    out = bayes_linear_forward(x, w_t, b_row, fout, fin)
    out = jax.block_until_ready(out)
    ref = (jnp.matmul(x.reshape(-1, in_features), weight_mu.T,
                      precision=lax.Precision.HIGHEST) + bias_mu
           ).reshape(batch, seq, out_features)
    assert out.shape == (batch, seq, out_features)
    assert jnp.allclose(out, ref, atol=2e-3, rtol=2e-3)

    # --- multi-block checks (both kernel paths, same data/reference) -------
    M2, K2, N2 = 192, 256, 384
    x_big = jax.random.normal(k_x2, (M2, K2), jnp.float32)
    w_big = xavier_uniform(k_w2, (N2, K2))
    b_big = jax.random.normal(k_b2, (N2,), jnp.float32) * 0.01
    ref_big = jnp.matmul(x_big, w_big.T, precision=lax.Precision.HIGHEST) + b_big

    w_t2, b_row2, fout2, fin2 = prepare_bayes_linear_params(w_big, b_big)

    # (a) full-K-resident path with multiple N blocks (grid ~ (1, 3))
    out_a = bayes_linear_forward(x_big, w_t2, b_row2, fout2, fin2)
    out_a = jax.block_until_ready(out_a)
    assert out_a.shape == (M2, N2)
    assert jnp.allclose(out_a, ref_big, atol=2e-3, rtol=2e-3)

    # (b) K-tiled accumulator path (forced small k_resident_max, tk=128)
    out_b = bayes_linear_forward(x_big, w_t2, b_row2, fout2, fin2,
                                 tk=128, k_resident_max=128)
    out_b = jax.block_until_ready(out_b)
    assert out_b.shape == (M2, N2)
    assert jnp.allclose(out_b, ref_big, atol=2e-3, rtol=2e-3)

    print("KERNEL_OK")
</pallas_src>

<mosaic_0001>
module attributes {stable_mosaic.version = 11 : i64} {
  func.func @_linear_bias_kernel(%arg0: i32, %arg1: i32, %arg2: memref<8x128xf32, #tpu.memory_space<vmem>>, %arg3: memref<128x128xf32, #tpu.memory_space<vmem>>, %arg4: memref<1x128xf32, #tpu.memory_space<vmem>>, %arg5: memref<8x128xf32, #tpu.memory_space<vmem>>) attributes {dimension_semantics = [#tpu.dimension_semantics<parallel>, #tpu.dimension_semantics<parallel>], iteration_bounds = array<i64: 1, 1>, scalar_prefetch = 0 : i64, scratch_operands = 0 : i64, tpu.core_type = #tpu.core_type<tc>, window_params = [{transform_indices = @transform_0, window_bounds = array<i64: 8, 128>}, {transform_indices = @transform_1, window_bounds = array<i64: 128, 128>}, {pipeline_mode = #tpu.pipeline_mode<synchronous>, transform_indices = @transform_2, window_bounds = array<i64: 1, 128>}, {transform_indices = @transform_3, window_bounds = array<i64: 8, 128>}]} {
    %c0 = arith.constant 0 : index
    %c0_0 = arith.constant 0 : index
    %0 = vector.load %arg2[%c0, %c0_0] : memref<8x128xf32, #tpu.memory_space<vmem>>, vector<8x128xf32>
    %c0_1 = arith.constant 0 : index
    %c0_2 = arith.constant 0 : index
    %1 = vector.load %arg3[%c0_1, %c0_2] : memref<128x128xf32, #tpu.memory_space<vmem>>, vector<128x128xf32>
    %cst = arith.constant dense<0.000000e+00> : vector<8x128xf32>
    %2 = tpu.matmul %0, %1, %cst {dimension_numbers = #tpu.dot_dimension_numbers<[1], [0], [0], [1], [0, 0, 1, 1], [], []>, precision = #tpu.contract_precision<fp32>} : vector<8x128xf32>, vector<128x128xf32>, vector<8x128xf32> -> vector<8x128xf32>
    %c128_i32 = arith.constant 128 : i32
    %3 = arith.muli %arg1, %c128_i32 : i32
    %4 = tpu.assume_multiple %3, 128 : i32
    %c0_3 = arith.constant 0 : index
    %5 = arith.index_cast %4 : i32 to index
    %6 = vector.load %arg4[%c0_3, %5] : memref<1x128xf32, #tpu.memory_space<vmem>>, vector<1x128xf32>
    %7 = vector.broadcast %6 : vector<1x128xf32> to vector<8x128xf32>
    %8 = arith.addf %2, %7 : vector<8x128xf32>
    %c0_4 = arith.constant 0 : index
    %c0_5 = arith.constant 0 : index
    %9 = vector.load %arg5[%c0_4, %c0_5] : memref<8x128xf32, #tpu.memory_space<vmem>>, vector<8x128xf32>
    tpu.vector_store %arg5[%c0_4, %c0_5], %8 {strides = array<i32>} : memref<8x128xf32, #tpu.memory_space<vmem>>, vector<8x128xf32>,
    return
  }
  func.func @transform_0(%arg0: i32, %arg1: i32) -> (i32, i32) {
    %c0_i32 = arith.constant 0 : i32
    %c0_i32_0 = arith.constant 0 : i32
    return %arg0, %c0_i32 : i32, i32
  }
  func.func @transform_1(%arg0: i32, %arg1: i32) -> (i32, i32) {
    %c0_i32 = arith.constant 0 : i32
    %c0_i32_0 = arith.constant 0 : i32
    return %c0_i32, %arg1 : i32, i32
  }
  func.func @transform_2(%arg0: i32, %arg1: i32) -> (i32, i32) {
    %c0_i32 = arith.constant 0 : i32
    %c0_i32_0 = arith.constant 0 : i32
    %c0_i32_1 = arith.constant 0 : i32
    return %c0_i32, %c0_i32_0 : i32, i32
  }
  func.func @transform_3(%arg0: i32, %arg1: i32) -> (i32, i32) {
    %c0_i32 = arith.constant 0 : i32
    return %arg0, %arg1 : i32, i32
  }
}

</mosaic_0001>

<bundles_post_ra>
// kernel: tpu_custom_call.1
= control target key start
LH: loop header
LB: loop body
LE: loop exit
PB: predicated region body
PF: predicated region fallthrough
CT: control target
= control target key end

     0   :  { %8 = vsyncpa [#allocation3], 0  ;;  %s1596_s0 = inlined_call_operand.hbm [shape: f32[8,128], index: 0, kind: input, shape index: {}]   ;;  %s1597_s1 = inlined_call_operand.hbm [shape: f32[128,128], index: 1, kind: input, shape index: {}]   ;;  %s1598_s2 = inlined_call_operand.vmem [shape: f32[1,128], index: 2, kind: input, shape index: {}]   ;;  %s1599_s3 = inlined_call_operand.hbm [shape: f32[8,128], index: 3, kind: output, shape index: {}]  }
   0x1   :  { %9 = vsyncpa [#allocation6], 0 }
   0x2   :  { %10 = vsyncpa [#allocation4], 0  ;;  %s1275_s12 = smov [#allocation2]   ;;  %s1276_s14 = smov [#allocation5]  }
   0x3   :  { %s17_s13 = sshll.u32 %s1275_s12, 4  ;;  %s26_s15 = sshll.u32 %s1276_s14, 4  ;;  %s18_s13 = int_to_ptr.vmem [resolvable:$true] %s17_s13  ;;  %s1303_s15 = int_to_ptr.vmem [resolvable:$true] %s26_s15 }
   0x4   :  { %s1203_s18 = scalar_lea.hbm %s1596_s0, 128 }
   0x5   :  { %p1204_p0 = scmp.ne.s32.totalorder %s1596_s0, %s1203_s18  ;;  %p1207_p1 = scmp.lt.u32.totalorder %s1203_s18, %s1596_s0 }
   0x7   :  { %p1209_p2 = pnand %p1207_p1, %p1204_p0 }
   0x9   :  { %1212 = shalt.err (!%p1209_p2)
}
   0xa   :  { %s1213_s23 = scalar_lea.vmem %s18_s13, 128  ;;  %p1218_p4 = scmp.lt.s32.totalorder %s18_s13, %s18_s13 }
   0xb   :  { %p1214_p3 = scmp.ne.s32.totalorder %s18_s13, %s1213_s23  ;;  %p1219_p5 = scmp.lt.s32.totalorder %s1213_s23, %s1213_s23 }
   0xd   :  { %p1220_p6 = por %p1219_p5, %p1218_p4 }
   0xf   :  { %p1221_p7 = pnand %p1220_p6, %p1214_p3 }
  0x11   :  { %1224 = shalt.err (!%p1221_p7)
}
  0x12   :  { %20 = dma.hbm_to_vmem [thread:$0]  %s1596_s0, 128, %s18_s13, [#allocation3]  }
  0x13   :  { %s1225_s28 = scalar_lea.hbm %s1597_s1, 2048 }
  0x14   :  { %p1226_p8 = scmp.ne.s32.totalorder %s1597_s1, %s1225_s28  ;;  %p1229_p9 = scmp.lt.u32.totalorder %s1225_s28, %s1597_s1 }
  0x16   :  { %p1231_p10 = pnand %p1229_p9, %p1226_p8 }
  0x18   :  { %1234 = shalt.err (!%p1231_p10)
}
  0x19   :  { %s1235_s6 = scalar_lea.vmem %s1303_s15, 2048  ;;  %p1240_p12 = scmp.lt.s32.totalorder %s1303_s15, %s1303_s15 }
  0x1a   :  { %p1236_p11 = scmp.ne.s32.totalorder %s1303_s15, %s1235_s6  ;;  %p1241_p13 = scmp.lt.s32.totalorder %s1235_s6, %s1235_s6 }
  0x1c   :  { %p1242_p0 = por %p1241_p13, %p1240_p12 }
  0x1e   :  { %p1243_p1 = pnand %p1242_p0, %p1236_p11 }
  0x20   :  { %1246 = shalt.err (!%p1243_p1)
}
  0x21   :  { %s1277_s0 = smov 128   ;;  %s1278_s7 = smov 8  }
  0x22   :  { %32 = dma.hbm_to_vmem [thread:$0]  %s1597_s1, 2048, %s1303_s15, [#allocation6], %s1277_s0, %s1277_s0, %s1278_s7  }
  0x23   :  { %1269 = dma.done.wait [#allocation3], 128  }
  0x24   :  { %1270 = vsyncadd [#allocation3], 4294967168 }
  0x25   :  { %1271 = dma.done.wait [#allocation6], 2048  }
  0x26   :  { %1272 = vsyncadd [#allocation6], 4294965248  ;;  %v1279_v0 = vmov 0.0|0.0   ;;  %vm1280_vm0 = vmmov 0   ;;  %v1281_v1 = vmov 0.0   ;;  %v42_v2 = vld [vmem:[#allocation5] sm:$0xff] }
  0x27   :  { %1041 = vmatprep.subr.bf16.mxu1 %v1279_v0  ;;  %1113 = vmatprep.subr.bf16.mxu0 %v1279_v0  ;;  %v43_v3 = vld [vmem:[#allocation5 + $0x8] sm:$0xff]  ;;  %v44_v4 = vld [vmem:[#allocation5 + $0x10] sm:$0xff]  ;;  %v70_v5 = vand.u32 4294901760, %v42_v2  ;;  %v45_v7 = vld [vmem:[#allocation5 + $0x18] sm:$0xff]  ;;  %s1282_s11 = smov [#allocation7]  }
  0x28   :  { %863 = vmatprep.mubr.msk.f32.mxu1 %vm1280_vm0, %v1281_v1  ;;  %968 = vmatprep.mubr.msk.f32.mxu0 %vm1280_vm0, %v1281_v1  ;;  %v73_v6 = vand.u32 4294901760, %v43_v3  ;;  %v76_v8 = vand.u32 4294901760, %v44_v4  ;;  %v79_v9 = vand.u32 4294901760, %v45_v7  ;;  %v46_v10 = vld [vmem:[#allocation5 + $0x20] sm:$0xff]  ;;  %v47_v11 = vld [vmem:[#allocation5 + $0x28] sm:$0xff]  ;;  %v48_v16 = vld [vmem:[#allocation5 + $0x30] sm:$0xff] }
  0x29   :  { %v82_v14 = vand.u32 4294901760, %v46_v10  ;;  %v85_v15 = vand.u32 4294901760, %v47_v11  ;;  %v49_v17 = vld [vmem:[#allocation5 + $0x38] sm:$0xff]  ;;  %v88_v19 = vand.u32 4294901760, %v48_v16  ;;  %v1354_v21 = vld [vmem:[#allocation5 + $0x40] sm:$0xff]  ;;  %v1356_v22 = vld [vmem:[#allocation5 + $0x48] sm:$0xff]  ;;  %v1370_v29 = vsub.f32 %v42_v2, %v70_v5 }
  0x2a   :  { %v1340_v12 = vpack.c.bf16 %v73_v6, %v70_v5  ;;  %v1344_v13 = vpack.c.bf16 %v79_v9, %v76_v8  ;;  %v91_v20 = vand.u32 4294901760, %v49_v17  ;;  %v94_v24 = vand.u32 4294901760, %v1354_v21  ;;  %v41_v26 = vld [vmem:[#allocation2] sm:$0xff]  ;;  %v1366_v27 = vld [vmem:[#allocation5 + $0x50] sm:$0xff]  ;;  %v1382_v35 = vld [vmem:[#allocation5 + $0x60] sm:$0xff]  ;;  %s717_s12 = sshll.u32 %s1282_s11, 4  ;;  %s718_s12 = int_to_ptr.vmem [resolvable:$true] %s717_s12 }
  0x2b   :  { %v1350_v18 = vpack.c.bf16 %v85_v15, %v82_v14  ;;  %v97_v25 = vand.u32 4294901760, %v1356_v22  ;;  %v1368_v28 = vld [vmem:[#allocation5 + $0x58] sm:$0xff]  ;;  %v1372_v30 = vand.u32 4294901760, %v41_v26  ;;  %v1374_v31 = vsub.f32 %v43_v3, %v73_v6  ;;  %v1386_v36 = vld [vmem:[#allocation5 + $0x68] sm:$0xff]  ;;  %v1405_v43 = vld [vmem:[#allocation5 + $0x70] sm:$0xff]  ;;  %s1247_s13 = scalar_lea.vmem %s718_s12, 128  ;;  %p1252_p3 = scmp.lt.s32.totalorder %s718_s12, %s718_s12 }
  0x2c   :  { %1043 = vmatpush3.bf16.msra.mxu1 %v1340_v12  ;;  %1115 = vmatpush3.bf16.msra.mxu0 %v1340_v12  ;;  %v1360_v23 = vpack.c.bf16 %v91_v20, %v88_v19  ;;  %v100_v33 = vand.u32 4294901760, %v1366_v27  ;;  %v103_v34 = vand.u32 4294901760, %v1368_v28  ;;  %v1388_v37 = vsub.f32 %v44_v4, %v76_v8  ;;  %v1407_v44 = vld [vmem:[#allocation5 + $0x78] sm:$0xff]  ;;  %p1248_p2 = scmp.ne.s32.totalorder %s718_s12, %s1247_s13  ;;  %p1253_p4 = scmp.lt.s32.totalorder %s1247_s13, %s1247_s13 }
  0x2d   :  { %1044 = vmatprep.subr.bf16.mxu1 %v1279_v0  ;;  %1116 = vmatprep.subr.bf16.mxu0 %v1279_v0  ;;  %v1378_v32 = vpack.c.bf16 %v97_v25, %v94_v24  ;;  %v1390_v38 = vsub.f32 %v45_v7, %v79_v9  ;;  %v106_v39 = vand.u32 4294901760, %v1382_v35  ;;  %v1394_v40 = vsub.f32 %v41_v26, %v1372_v30 }
  0x2e   :  { %v1402_v41 = vpack.c.bf16 %v103_v34, %v100_v33  ;;  %v109_v42 = vand.u32 4294901760, %v1386_v36  ;;  %v163_v45 = vand.u32 4294901760, %v1370_v29  ;;  %v170_v46 = vand.u32 4294901760, %v1374_v31  ;;  %p1254_p5 = por %p1253_p4, %p1252_p3 }
  0x2f   :  { %v1413_v47 = vsub.f32 %v46_v10, %v82_v14  ;;  %v1415_v48 = vsub.f32 %v47_v11, %v85_v15  ;;  %v112_v49 = vand.u32 4294901760, %v1405_v43  ;;  %v115_v50 = vand.u32 4294901760, %v1407_v44 }
  0x30   :  { %1046 = vmatpush3.bf16.msra.mxu1 %v1344_v13  ;;  %1118 = vmatpush3.bf16.msra.mxu0 %v1344_v13  ;;  %v152_v51 = vand.u32 4294901760, %v1394_v40  ;;  %v177_v52 = vand.u32 4294901760, %v1388_v37  ;;  %v1427_v53 = vpack.c.bf16 %v109_v42, %v106_v39  ;;  %v164_v54 = vsub.f32 %v1370_v29, %v163_v45  ;;  %p1255_p6 = pnand %p1254_p5, %p1248_p2 }
  0x31   :  { %1047 = vmatprep.subr.bf16.mxu1 %v1279_v0  ;;  %1119 = vmatprep.subr.bf16.mxu0 %v1279_v0  ;;  %v171_v55 = vsub.f32 %v1374_v31, %v170_v46  ;;  %v184_v56 = vand.u32 4294901760, %v1390_v38  ;;  %v1434_v57 = vsub.f32 %v48_v16, %v88_v19  ;;  %v1436_v58 = vsub.f32 %v49_v17, %v91_v20 }
  0x32   :  { %v153_v59 = vsub.f32 %v1394_v40, %v152_v51  ;;  %v178_v60 = vsub.f32 %v1388_v37, %v177_v52  ;;  %v191_v61 = vand.u32 4294901760, %v1413_v47  ;;  %v198_v62 = vand.u32 4294901760, %v1415_v48 }
  0x33   :  { %v1448_v63 = vpack.c.bf16 %v115_v50, %v112_v49  ;;  %v165_v2 = vand.u32 4294901760, %v164_v54  ;;  %v172_v3 = vand.u32 4294901760, %v171_v55  ;;  %v185_v4 = vsub.f32 %v1390_v38, %v184_v56 }
  0x34   :  { %1049 = vmatpush3.bf16.msra.mxu1 %v1350_v18  ;;  %1121 = vmatpush3.bf16.msra.mxu0 %v1350_v18  ;;  %v1454_v5 = vsub.f32 %v1354_v21, %v94_v24  ;;  %v1457_v6 = vsub.f32 %v1356_v22, %v97_v25  ;;  %v1138_v7 = vpack.c.bf16 %v170_v46, %v163_v45  ;;  %v154_v8 = vand.u32 4294901760, %v153_v59 }
  0x35   :  { %1050 = vmatprep.subr.bf16.mxu1 %v1279_v0  ;;  %1122 = vmatprep.subr.bf16.mxu0 %v1279_v0  ;;  %v179_v9 = vand.u32 4294901760, %v178_v60  ;;  %v192_v10 = vsub.f32 %v1413_v47, %v191_v61  ;;  %v199_v11 = vsub.f32 %v1415_v48, %v198_v62  ;;  %v1066_v14 = vpack.c.bf16 %v172_v3, %v165_v2 }
  0x36   :  { %v186_v15 = vand.u32 4294901760, %v185_v4  ;;  %v205_v16 = vand.u32 4294901760, %v1434_v57  ;;  %v212_v17 = vand.u32 4294901760, %v1436_v58  ;;  %v1470_v19 = vsub.f32 %v1366_v27, %v100_v33 }
  0x37   :  { %v1475_v20 = vsub.f32 %v1368_v28, %v103_v34  ;;  %v1141_v21 = vpack.c.bf16 %v184_v56, %v177_v52  ;;  %v193_v22 = vand.u32 4294901760, %v192_v10  ;;  %v200_v24 = vand.u32 4294901760, %v199_v11 }
  0x38   :  { %1052 = vmatpush3.bf16.msra.mxu1 %v1360_v23  ;;  %1124 = vmatpush3.bf16.msra.mxu0 %v1360_v23  ;;  %v219_v25 = vand.u32 4294901760, %v1454_v5  ;;  %v1069_v26 = vpack.c.bf16 %v186_v15, %v179_v9  ;;  %v206_v45 = vsub.f32 %v1434_v57, %v205_v16  ;;  %v213_v27 = vsub.f32 %v1436_v58, %v212_v17 }
  0x39   :  { %1053 = vmatprep.subr.bf16.mxu1 %v1279_v0  ;;  %1125 = vmatprep.subr.bf16.mxu0 %v1279_v0  ;;  %v226_v33 = vand.u32 4294901760, %v1457_v6  ;;  %v1486_v28 = vsub.f32 %v1382_v35, %v106_v39  ;;  %v1491_v34 = vsub.f32 %v1386_v36, %v109_v42  ;;  %v1072_v46 = vpack.c.bf16 %v200_v24, %v193_v22 }
  0x3a   :  { %v220_v52 = vsub.f32 %v1454_v5, %v219_v25  ;;  %v233_v54 = vand.u32 4294901760, %v1470_v19  ;;  %v207_v35 = vand.u32 4294901760, %v206_v45  ;;  %v214_v39 = vand.u32 4294901760, %v213_v27 }
  0x3b   :  { %v227_v55 = vsub.f32 %v1457_v6, %v226_v33  ;;  %v240_v36 = vand.u32 4294901760, %v1475_v20  ;;  %v1506_v42 = vsub.f32 %v1405_v43, %v112_v49  ;;  %v1511_v56 = vsub.f32 %v1407_v44, %v115_v50 }
  0x3c   :  { %1055 = vmatpush3.bf16.msra.mxu1 %v1378_v32  ;;  %1127 = vmatpush3.bf16.msra.mxu0 %v1378_v32  ;;  %v1147_v59 = vpack.c.bf16 %v212_v17, %v205_v16  ;;  %v221_v60 = vand.u32 4294901760, %v220_v52  ;;  %v1075_v2 = vpack.c.bf16 %v214_v39, %v207_v35  ;;  %v254_v43 = vand.u32 4294901760, %v1491_v34 }
  0x3d   :  { %1056 = vmatprep.subr.bf16.mxu1 %v1279_v0  ;;  %1128 = vmatprep.subr.bf16.mxu0 %v1279_v0  ;;  %v228_v3 = vand.u32 4294901760, %v227_v55  ;;  %v241_v4 = vsub.f32 %v1475_v20, %v240_v36  ;;  %v1150_v44 = vpack.c.bf16 %v226_v33, %v219_v25  ;;  %v268_v11 = vand.u32 4294901760, %v1511_v56 }
  0x3e   :  { %v255_v10 = vsub.f32 %v1491_v34, %v254_v43 }
  0x3f   :  { %v242_v9 = vand.u32 4294901760, %v241_v4  ;;  %v269_v22 = vsub.f32 %v1511_v56, %v268_v11 }
  0x40   :  { %1058 = vmatpush3.bf16.msra.mxu1 %v1402_v41  ;;  %1130 = vmatpush3.bf16.msra.mxu0 %v1402_v41  ;;  %v256_v17 = vand.u32 4294901760, %v255_v10 }
  0x41   :  { %1059 = vmatprep.subr.bf16.mxu1 %v1279_v0  ;;  %1131 = vmatprep.subr.bf16.mxu0 %v1279_v0  ;;  %v270_v45 = vand.u32 4294901760, %v269_v22 }
  0x44   :  { %1061 = vmatpush3.bf16.msra.mxu1 %v1427_v53  ;;  %1133 = vmatpush3.bf16.msra.mxu0 %v1427_v53 }
  0x45   :  { %1062 = vmatprep.subr.bf16.mxu1 %v1279_v0  ;;  %1134 = vmatprep.subr.bf16.mxu0 %v1279_v0 }
  0x48   :  { %1064 = vmatpush3.bf16.msra.mxu1 %v1448_v63  ;;  %1136 = vmatpush3.bf16.msra.mxu0 %v1448_v63 }
  0x49   :  { %1065 = vmatprep.subr.bf16.mxu1 %v1279_v0  ;;  %1137 = vmatprep.subr.bf16.mxu0 %v1279_v0 }
  0x4b   :  { %864 = vmatmul.mubr.f32.vlgmr.msra.gmra.mrb[0].mxu1 %v154_v8  ;;  %969 = vmatmul.mubr.f32.vlgmr.msra.gmra.mrb[0].mxu0 %v152_v51  ;;  %v1144_v51 = vpack.c.bf16 %v198_v62, %v191_v61  ;;  %v234_v61 = vsub.f32 %v1470_v19, %v233_v54  ;;  %v247_v62 = vand.u32 4294901760, %v1486_v28  ;;  %v1078_v8 = vpack.c.bf16 %v228_v3, %v221_v60 }
  0x4c   :  { %1067 = vmatpush3.bf16.msra.mxu1 %v1066_v14  ;;  %1139 = vmatpush3.bf16.msra.mxu0 %v1138_v7  ;;  %v261_v7 = vand.u32 4294901760, %v1506_v42  ;;  %v1153_v14 = vpack.c.bf16 %v240_v36, %v233_v54 }
  0x4d   :  { %1068 = vmatprep.subr.bf16.mxu1 %v1279_v0  ;;  %1140 = vmatprep.subr.bf16.mxu0 %v1279_v0  ;;  %v235_v49 = vand.u32 4294901760, %v234_v61  ;;  %v248_v50 = vsub.f32 %v1486_v28, %v247_v62  ;;  %v1156_v25 = vpack.c.bf16 %v254_v43, %v247_v62 }
  0x4e   :  { %898 = vmatprep.mubr.msk.f32.mxu1 %vm1280_vm0, %v1281_v1  ;;  %1003 = vmatprep.mubr.msk.f32.mxu0 %vm1280_vm0, %v1281_v1  ;;  %v1159_v33 = vpack.c.bf16 %v268_v11, %v261_v7 }
  0x4f   :  { %v249_v15 = vand.u32 4294901760, %v248_v50  ;;  %v1081_v16 = vpack.c.bf16 %v242_v9, %v235_v49 }
  0x50   :  { %1070 = vmatpush3.bf16.msra.mxu1 %v1069_v26  ;;  %1142 = vmatpush3.bf16.msra.mxu0 %v1141_v21  ;;  %v262_v21 = vsub.f32 %v1506_v42, %v261_v7 }
  0x51   :  { %1071 = vmatprep.subr.bf16.mxu1 %v1279_v0  ;;  %1143 = vmatprep.subr.bf16.mxu0 %v1279_v0  ;;  %v1084_v24 = vpack.c.bf16 %v256_v17, %v249_v15 }
  0x52   :  { %v263_v26 = vand.u32 4294901760, %v262_v21 }
  0x54   :  { %1073 = vmatpush3.bf16.msra.mxu1 %v1072_v46  ;;  %1145 = vmatpush3.bf16.msra.mxu0 %v1144_v51  ;;  %v1087_v27 = vpack.c.bf16 %v270_v45, %v263_v26  ;;  %v1090_v46 = vpack.c.bf16 %v1374_v31, %v1370_v29  ;;  %v1093_v51 = vpack.c.bf16 %v1390_v38, %v1388_v37  ;;  %v728_v31 = vld [vmem:[%s1598_s2] ss:$0 sm:$0xff] }
  0x55   :  { %1074 = vmatprep.subr.bf16.mxu1 %v1279_v0  ;;  %1146 = vmatprep.subr.bf16.mxu0 %v1279_v0  ;;  %v1096_v29 = vpack.c.bf16 %v1415_v48, %v1413_v47 }
  0x58   :  { %1076 = vmatpush3.bf16.msra.mxu1 %v1075_v2  ;;  %1148 = vmatpush3.bf16.msra.mxu0 %v1147_v59 }
  0x59   :  { %1077 = vmatprep.subr.bf16.mxu1 %v1279_v0  ;;  %1149 = vmatprep.subr.bf16.mxu0 %v1279_v0 }
  0x5c   :  { %1079 = vmatpush3.bf16.msra.mxu1 %v1078_v8  ;;  %1151 = vmatpush3.bf16.msra.mxu0 %v1150_v44 }
  0x5d   :  { %1080 = vmatprep.subr.bf16.mxu1 %v1279_v0  ;;  %1152 = vmatprep.subr.bf16.mxu0 %v1279_v0 }
  0x60   :  { %1082 = vmatpush3.bf16.msra.mxu1 %v1081_v16  ;;  %1154 = vmatpush3.bf16.msra.mxu0 %v1153_v14 }
  0x61   :  { %1083 = vmatprep.subr.bf16.mxu1 %v1279_v0  ;;  %1155 = vmatprep.subr.bf16.mxu0 %v1279_v0 }
  0x64   :  { %1085 = vmatpush3.bf16.msra.mxu1 %v1084_v24  ;;  %1157 = vmatpush3.bf16.msra.mxu0 %v1156_v25 }
  0x65   :  { %1086 = vmatprep.subr.bf16.mxu1 %v1279_v0  ;;  %1158 = vmatprep.subr.bf16.mxu0 %v1279_v0 }
  0x68   :  { %1088 = vmatpush3.bf16.msra.mxu1 %v1087_v27  ;;  %1160 = vmatpush3.bf16.msra.mxu0 %v1159_v33 }
  0x69   :  { %1089 = vmatprep.subr.bf16.mxu1 %v1279_v0  ;;  %1161 = vmatprep.subr.bf16.mxu0 %v1279_v0 }
  0x6b   :  { %899 = vmatmul.mubr.f32.vlgmr.msra.gmra.mrb[0].mxu1 %v1372_v30  ;;  %1004 = vmatmul.mubr.f32.vlgmr.msra.gmra.mrb[0].mxu0 %v1372_v30 }
  0x6c   :  { %1091 = vmatpush3.bf16.msra.mxu1 %v1090_v46  ;;  %1163 = vmatpush3.bf16.msra.mxu0 %v1340_v12  ;;  %v1099_v12 = vpack.c.bf16 %v1436_v58, %v1434_v57 }
  0x6d   :  { %1092 = vmatprep.subr.bf16.mxu1 %v1279_v0  ;;  %1164 = vmatprep.subr.bf16.mxu0 %v1279_v0 }
  0x6e   :  { %933 = vmatprep.mubr.msk.f32.mxu1 %vm1280_vm0, %v1281_v1  ;;  %1038 = vmatprep.mubr.msk.f32.mxu0 %vm1280_vm0, %v1281_v1  ;;  %v1102_v1 = vpack.c.bf16 %v1457_v6, %v1454_v5 }
  0x70   :  { %1094 = vmatpush3.bf16.msra.mxu1 %v1093_v51  ;;  %1166 = vmatpush3.bf16.msra.mxu0 %v1344_v13  ;;  %v1105_v13 = vpack.c.bf16 %v1475_v20, %v1470_v19 }
  0x71   :  { %1095 = vmatprep.subr.bf16.mxu1 %v1279_v0  ;;  %1167 = vmatprep.subr.bf16.mxu0 %v1279_v0 }
  0x74   :  { %1097 = vmatpush3.bf16.msra.mxu1 %v1096_v29  ;;  %1169 = vmatpush3.bf16.msra.mxu0 %v1350_v18  ;;  %v1108_v18 = vpack.c.bf16 %v1491_v34, %v1486_v28 }
  0x75   :  { %1098 = vmatprep.subr.bf16.mxu1 %v1279_v0  ;;  %1170 = vmatprep.subr.bf16.mxu0 %v1279_v0 }
  0x78   :  { %1100 = vmatpush3.bf16.msra.mxu1 %v1099_v12  ;;  %1172 = vmatpush3.bf16.msra.mxu0 %v1360_v23  ;;  %v1111_v23 = vpack.c.bf16 %v1511_v56, %v1506_v42 }
  0x79   :  { %1101 = vmatprep.subr.bf16.mxu1 %v1279_v0  ;;  %1173 = vmatprep.subr.bf16.mxu0 %v1279_v0 }
  0x7c   :  { %1103 = vmatpush3.bf16.msra.mxu1 %v1102_v1  ;;  %1175 = vmatpush3.bf16.msra.mxu0 %v1378_v32 }
  0x7d   :  { %1104 = vmatprep.subr.bf16.mxu1 %v1279_v0  ;;  %1176 = vmatprep.subr.bf16.mxu0 %v1279_v0 }
  0x80   :  { %1106 = vmatpush3.bf16.msra.mxu1 %v1105_v13  ;;  %1178 = vmatpush3.bf16.msra.mxu0 %v1402_v41 }
  0x81   :  { %1107 = vmatprep.subr.bf16.mxu1 %v1279_v0  ;;  %1179 = vmatprep.subr.bf16.mxu0 %v1279_v0 }
  0x84   :  { %1109 = vmatpush3.bf16.msra.mxu1 %v1108_v18  ;;  %1181 = vmatpush3.bf16.msra.mxu0 %v1427_v53 }
  0x85   :  { %1110 = vmatprep.subr.bf16.mxu1 %v1279_v0  ;;  %1182 = vmatprep.subr.bf16.mxu0 %v1279_v0 }
  0x88   :  { %1112 = vmatpush3.bf16.msra.mxu1 %v1111_v23  ;;  %1184 = vmatpush3.bf16.msra.mxu0 %v1448_v63 }
  0x8b   :  { %934 = vmatmul.mubr.f32.vlgmr.msra.gmra.mrb[0].mxu1 %v1394_v40  ;;  %1039 = vmatmul.mubr.f32.vlgmr.msra.gmra.mrb[0].mxu0 %v1372_v30 }
 0x15e   :  { %v411_v32 = vpop.f32.mrb[0].mxu1  ;;  %v706_v37 = vpop.f32.mrb[0].mxu0 }
 0x15f   :  { %v1185_v38 = vadd.f32 %v728_v31, %v411_v32  ;;  %v935_v41 = vpop.f32.mrb[1].mxu1  ;;  %v1040_v47 = vpop.f32.mrb[1].mxu0 }
 0x161   :  { %v1186_v48 = vadd.f32 %v1185_v38, %v706_v37 }
 0x163   :  { %710 = vst [vmem:[#allocation7] sm:$0xff] %v1186_v48 }
 0x164   :  { %1258 = shalt.err (!%p1255_p6)
}
 0x165   :  { %s1259_s2 = scalar_lea.hbm %s1599_s3, 128 }
 0x166   :  { %p1260_p7 = scmp.ne.s32.totalorder %s1599_s3, %s1259_s2  ;;  %p1263_p8 = scmp.lt.u32.totalorder %s1259_s2, %s1599_s3 }
 0x168   :  { %p1265_p9 = pnand %p1263_p8, %p1260_p7 }
 0x16a   :  { %1268 = shalt.err (!%p1265_p9)
}
 0x16b   :  { %720 = dma.vmem_to_hbm [thread:$0]  %s718_s12, 128, %s1599_s3, [#allocation4]  }
 0x16c   :  { %1273 = dma.done.wait [#allocation4], 128  }
 0x16d   :  { %1274 = vsyncadd [#allocation4], 4294967168 }
 0x16e   :  { %724 = vsyncpa [#allocation3], 1 }
 0x16f   :  { %725 = vsyncpa [#allocation6], 1 }
 0x170   :  { %726 = vsyncpa [#allocation4], 1 }

</bundles_post_ra>
